<compile_context>
chip_gen: v7x
topology: tpu7x:2x2x1
jax: 0.10.0
libtpu: 0.0.40
codegen_flags: <defaults>
</compile_context>

<pallas_src>
import jax
import jax.numpy as jnp
from jax.experimental import pallas as pl
from jax.experimental.pallas import tpu as pltpu

IN_FEATURES = 16 * 16   # 256
HIDDEN = 32
OUT_FEATURES = 26
OUT_PAD = 32            # lane padding 26 -> 32 in HBM (block width == array width)
TILE_M_DEFAULT = 4096   # rows per grid step (4 MiB x-tile, double-buffered)


def _round_up(x, m):
    return ((x + m - 1) // m) * m


def mlp_kernel(x_ref, w1_ref, b1_ref, w2_ref, b2_ref, o_ref):
    # One batch tile: fc1 + bias + ReLU + fc2 + bias, all in VMEM, f32 MXU accum.
    x = x_ref[...]                                                  # (TILE_M, 256)
    h = jnp.dot(x, w1_ref[...], preferred_element_type=jnp.float32)
    h = jnp.maximum(h + b1_ref[...], 0.0)                           # (TILE_M, 32)
    y = jnp.dot(h, w2_ref[...], preferred_element_type=jnp.float32)
    o_ref[...] = (y + b2_ref[...]).astype(o_ref.dtype)              # (TILE_M, 32)


def _pick_tile_m(n, tile_m):
    # Sublane-aligned (multiple of 8).  Aim for >= 4 grid steps so both v7x
    # TensorCores get batch tiles, while keeping tiles big enough to amortize
    # the ~0.35 us per-grid-step overhead.
    quarter = _round_up(pl.cdiv(n, 4), 8)
    return max(8, min(tile_m, quarter))


def simple_nn_forward(x, w1, b1, w2, b2, *, tile_m=TILE_M_DEFAULT):
    """x: (N, 16, 16) or (N, 1, 16, 16) float32 -> logits (N, 26)."""
    n = x.shape[0]
    x_flat = x.reshape(n, IN_FEATURES).astype(jnp.float32)          # mirrors x.view(-1, 256)

    tm = _pick_tile_m(n, tile_m)
    grid = (pl.cdiv(n, tm),)   # ragged last block handled by Pallas (no pad pass)

    # Biases as 2-D rows; pad fc2 weight/bias to 32 output lanes.
    b1_2d = b1.reshape(1, HIDDEN).astype(jnp.float32)
    w2_p = jnp.zeros((HIDDEN, OUT_PAD), jnp.float32).at[:, :OUT_FEATURES].set(w2)
    b2_p = jnp.zeros((1, OUT_PAD), jnp.float32).at[0, :OUT_FEATURES].set(b2)

    # Double-buffered x/out tiles + resident weights, with headroom.
    vmem_bytes = 2 * tm * IN_FEATURES * 4 + 2 * tm * OUT_PAD * 4 + (2 << 20)
    vmem_bytes = int(min(max(vmem_bytes, 4 << 20), 32 << 20))

    out_padded = pl.pallas_call(
        mlp_kernel,
        out_shape=jax.ShapeDtypeStruct((n, OUT_PAD), jnp.float32),
        grid=grid,
        in_specs=[
            pl.BlockSpec((tm, IN_FEATURES), lambda i: (i, 0)),        # x tile (streamed)
            pl.BlockSpec((IN_FEATURES, HIDDEN), lambda i: (0, 0)),    # w1 (resident)
            pl.BlockSpec((1, HIDDEN), lambda i: (0, 0)),              # b1 (resident)
            pl.BlockSpec((HIDDEN, OUT_PAD), lambda i: (0, 0)),        # w2 padded (resident)
            pl.BlockSpec((1, OUT_PAD), lambda i: (0, 0)),             # b2 padded (resident)
        ],
        out_specs=pl.BlockSpec((tm, OUT_PAD), lambda i: (i, 0)),
        compiler_params=pltpu.CompilerParams(
            dimension_semantics=("parallel",),                        # megacore split on v7x
            vmem_limit_bytes=vmem_bytes,
        ),
    )(x_flat, w1, b1_2d, w2_p, b2_p)

    # Row slice is a no-op now; only the cheap 32->26 column slice remains.
    return out_padded[:, :OUT_FEATURES]


def init_params(key):
    """Deterministic init mimicking nn.Linear's U(-1/sqrt(fan_in), 1/sqrt(fan_in))."""
    k1, k2, k3, k4 = jax.random.split(key, 4)
    bound1 = 1.0 / jnp.sqrt(IN_FEATURES)
    bound2 = 1.0 / jnp.sqrt(HIDDEN)
    w1 = jax.random.uniform(k1, (IN_FEATURES, HIDDEN), jnp.float32, -bound1, bound1)
    b1 = jax.random.uniform(k2, (HIDDEN,), jnp.float32, -bound1, bound1)
    w2 = jax.random.uniform(k3, (HIDDEN, OUT_FEATURES), jnp.float32, -bound2, bound2)
    b2 = jax.random.uniform(k4, (OUT_FEATURES,), jnp.float32, -bound2, bound2)
    return w1, b1, w2, b2


if __name__ == "__main__":
    key = jax.random.PRNGKey(0)
    k_x, k_p = jax.random.split(key)

    batch = 8
    x = jax.random.normal(k_x, (batch, 16, 16), jnp.float32)         # 16x16 "images"
    w1, b1, w2, b2 = init_params(k_p)

    out = simple_nn_forward(x, w1, b1, w2, b2)
    out = jax.block_until_ready(out)

    # Reference check in plain JAX.
    x_flat = x.reshape(batch, IN_FEATURES)
    ref = jnp.maximum(x_flat @ w1 + b1, 0.0) @ w2 + b2
    assert out.shape == (batch, OUT_FEATURES)
    assert jnp.allclose(out, ref, atol=1e-5, rtol=1e-5)

    print("KERNEL_OK")
</pallas_src>

<mosaic_0001>
module attributes {stable_mosaic.version = 11 : i64} {
  func.func @mlp_kernel(%arg0: i32, %arg1: memref<8x256xf32, #tpu.memory_space<vmem>>, %arg2: memref<256x32xf32, #tpu.memory_space<vmem>>, %arg3: memref<1x32xf32, #tpu.memory_space<vmem>>, %arg4: memref<32x32xf32, #tpu.memory_space<vmem>>, %arg5: memref<1x32xf32, #tpu.memory_space<vmem>>, %arg6: memref<8x32xf32, #tpu.memory_space<vmem>>) attributes {dimension_semantics = [#tpu.dimension_semantics<parallel>], iteration_bounds = array<i64: 1>, scalar_prefetch = 0 : i64, scratch_operands = 0 : i64, tpu.core_type = #tpu.core_type<tc>, window_params = [{transform_indices = @transform_0, window_bounds = array<i64: 8, 256>}, {pipeline_mode = #tpu.pipeline_mode<synchronous>, transform_indices = @transform_1, window_bounds = array<i64: 256, 32>}, {pipeline_mode = #tpu.pipeline_mode<synchronous>, transform_indices = @transform_2, window_bounds = array<i64: 1, 32>}, {pipeline_mode = #tpu.pipeline_mode<synchronous>, transform_indices = @transform_3, window_bounds = array<i64: 32, 32>}, {pipeline_mode = #tpu.pipeline_mode<synchronous>, transform_indices = @transform_4, window_bounds = array<i64: 1, 32>}, {transform_indices = @transform_5, window_bounds = array<i64: 8, 32>}]} {
    %c0 = arith.constant 0 : index
    %c0_0 = arith.constant 0 : index
    %0 = vector.load %arg1[%c0, %c0_0] : memref<8x256xf32, #tpu.memory_space<vmem>>, vector<8x256xf32>
    %c0_1 = arith.constant 0 : index
    %c0_2 = arith.constant 0 : index
    %1 = vector.load %arg2[%c0_1, %c0_2] : memref<256x32xf32, #tpu.memory_space<vmem>>, vector<256x32xf32>
    %cst = arith.constant dense<0.000000e+00> : vector<8x32xf32>
    %2 = tpu.matmul %0, %1, %cst {dimension_numbers = #tpu.dot_dimension_numbers<[1], [0], [0], [1], [0, 0, 1, 1], [], []>} : vector<8x256xf32>, vector<256x32xf32>, vector<8x32xf32> -> vector<8x32xf32>
    %c0_3 = arith.constant 0 : index
    %c0_4 = arith.constant 0 : index
    %3 = vector.load %arg3[%c0_3, %c0_4] : memref<1x32xf32, #tpu.memory_space<vmem>>, vector<1x32xf32>
    %4 = vector.broadcast %3 : vector<1x32xf32> to vector<8x32xf32>
    %5 = arith.addf %2, %4 : vector<8x32xf32>
    %cst_5 = arith.constant 0.000000e+00 : f32
    %6 = vector.broadcast %cst_5 : f32 to vector<8x32xf32>
    %7 = arith.maximumf %5, %6 : vector<8x32xf32>
    %c0_6 = arith.constant 0 : index
    %c0_7 = arith.constant 0 : index
    %8 = vector.load %arg4[%c0_6, %c0_7] : memref<32x32xf32, #tpu.memory_space<vmem>>, vector<32x32xf32>
    %cst_8 = arith.constant dense<0.000000e+00> : vector<8x32xf32>
    %9 = tpu.matmul %7, %8, %cst_8 {dimension_numbers = #tpu.dot_dimension_numbers<[1], [0], [0], [1], [0, 0, 1, 1], [], []>} : vector<8x32xf32>, vector<32x32xf32>, vector<8x32xf32> -> vector<8x32xf32>
    %c0_9 = arith.constant 0 : index
    %c0_10 = arith.constant 0 : index
    %10 = vector.load %arg5[%c0_9, %c0_10] : memref<1x32xf32, #tpu.memory_space<vmem>>, vector<1x32xf32>
    %11 = vector.broadcast %10 : vector<1x32xf32> to vector<8x32xf32>
    %12 = arith.addf %9, %11 : vector<8x32xf32>
    %c0_11 = arith.constant 0 : index
    %c0_12 = arith.constant 0 : index
    %13 = vector.load %arg6[%c0_11, %c0_12] : memref<8x32xf32, #tpu.memory_space<vmem>>, vector<8x32xf32>
    tpu.vector_store %arg6[%c0_11, %c0_12], %12 {strides = array<i32>} : memref<8x32xf32, #tpu.memory_space<vmem>>, vector<8x32xf32>,
    return
  }
  func.func @transform_0(%arg0: i32) -> (i32, i32) {
    %c0_i32 = arith.constant 0 : i32
    %c0_i32_0 = arith.constant 0 : i32
    return %arg0, %c0_i32 : i32, i32
  }
  func.func @transform_1(%arg0: i32) -> (i32, i32) {
    %c0_i32 = arith.constant 0 : i32
    %c0_i32_0 = arith.constant 0 : i32
    %c0_i32_1 = arith.constant 0 : i32
    return %c0_i32, %c0_i32_0 : i32, i32
  }
  func.func @transform_2(%arg0: i32) -> (i32, i32) {
    %c0_i32 = arith.constant 0 : i32
    %c0_i32_0 = arith.constant 0 : i32
    %c0_i32_1 = arith.constant 0 : i32
    return %c0_i32, %c0_i32_0 : i32, i32
  }
  func.func @transform_3(%arg0: i32) -> (i32, i32) {
    %c0_i32 = arith.constant 0 : i32
    %c0_i32_0 = arith.constant 0 : i32
    %c0_i32_1 = arith.constant 0 : i32
    return %c0_i32, %c0_i32_0 : i32, i32
  }
  func.func @transform_4(%arg0: i32) -> (i32, i32) {
    %c0_i32 = arith.constant 0 : i32
    %c0_i32_0 = arith.constant 0 : i32
    %c0_i32_1 = arith.constant 0 : i32
    return %c0_i32, %c0_i32_0 : i32, i32
  }
  func.func @transform_5(%arg0: i32) -> (i32, i32) {
    %c0_i32 = arith.constant 0 : i32
    %c0_i32_0 = arith.constant 0 : i32
    return %arg0, %c0_i32 : i32, i32
  }
}

</mosaic_0001>

<bundles_post_ra>
// kernel: tpu_custom_call.1
= control target key start
LH: loop header
LB: loop body
LE: loop exit
PB: predicated region body
PF: predicated region fallthrough
CT: control target
= control target key end

     0   :  { %s519_s0 = inlined_call_operand.vmem [shape: f32[8,256], index: 0, kind: input, shape index: {}]   ;;  %s520_s1 = inlined_call_operand.vmem [shape: f32[256,32], index: 1, kind: input, shape index: {}]   ;;  %s521_s2 = inlined_call_operand.vmem [shape: f32[1,32], index: 2, kind: input, shape index: {}]   ;;  %s522_s3 = inlined_call_operand.vmem [shape: f32[32,32], index: 3, kind: input, shape index: {}]   ;;  %s523_s4 = inlined_call_operand.vmem [shape: f32[1,32], index: 4, kind: input, shape index: {}]   ;;  %s524_s5 = inlined_call_operand.hbm [shape: f32[8,32], index: 5, kind: output, shape index: {}]  }
   0x1   :  { %v39_v0 = vld [vmem:[%s520_s1 + $0x80] sm:$0xff]  ;;  %v40_v1 = vld [vmem:[%s520_s1 + $0x88] sm:$0xff]  ;;  %v41_v5 = vld [vmem:[%s520_s1 + $0x90] sm:$0xff] }
   0x2   :  { %v23_v2 = vld [vmem:[%s520_s1] sm:$0xff]  ;;  %v287_v3 = vpack.c.bf16 %v40_v1, %v39_v0  ;;  %v24_v4 = vld [vmem:[%s520_s1 + $0x8] sm:$0xff]  ;;  %v42_v6 = vld [vmem:[%s520_s1 + $0x98] sm:$0xff] }
   0x3   :  { %v289_v7 = vpack.c.bf16 %v24_v4, %v23_v2  ;;  %v291_v8 = vpack.c.bf16 %v42_v6, %v41_v5  ;;  %v25_v9 = vld [vmem:[%s520_s1 + $0x10] sm:$0xff]  ;;  %v26_v10 = vld [vmem:[%s520_s1 + $0x18] sm:$0xff]  ;;  %v43_v11 = vld [vmem:[%s520_s1 + $0xa0] sm:$0xff] }
   0x4   :  { %288 = vmatprep.subr.bf16.mxu0 %v287_v3  ;;  %v44_v12 = vld [vmem:[%s520_s1 + $0xa8] sm:$0xff]  ;;  %v293_v13 = vpack.c.bf16 %v26_v10, %v25_v9  ;;  %v27_v15 = vld [vmem:[%s520_s1 + $0x20] sm:$0xff]  ;;  %v45_v17 = vld [vmem:[%s520_s1 + $0xb0] sm:$0xff] }
   0x5   :  { %290 = vmatpush3.bf16.msra.mxu0 %v289_v7  ;;  %v295_v14 = vpack.c.bf16 %v44_v12, %v43_v11  ;;  %v28_v16 = vld [vmem:[%s520_s1 + $0x28] sm:$0xff]  ;;  %v46_v18 = vld [vmem:[%s520_s1 + $0xb8] sm:$0xff]  ;;  %v29_v21 = vld [vmem:[%s520_s1 + $0x30] sm:$0xff] }
   0x6   :  { %292 = vmatprep.subr.bf16.mxu0 %v291_v8  ;;  %v297_v19 = vpack.c.bf16 %v28_v16, %v27_v15  ;;  %v299_v20 = vpack.c.bf16 %v46_v18, %v45_v17  ;;  %v30_v22 = vld [vmem:[%s520_s1 + $0x38] sm:$0xff]  ;;  %v47_v23 = vld [vmem:[%s520_s1 + $0xc0] sm:$0xff]  ;;  %v48_v24 = vld [vmem:[%s520_s1 + $0xc8] sm:$0xff] }
   0x7   :  { %v22_v25 = vld [vmem:[%s519_s0 + $0x8] sm:$0xff] }
   0x8   :  { %126 = vmatprep.mubr.f32.mxu0 %v22_v25 }
   0x9   :  { %294 = vmatpush3.bf16.msra.mxu0 %v293_v13 }
   0xa   :  { %296 = vmatprep.subr.bf16.mxu0 %v295_v14 }
   0xb   :  { %10 = vsyncpa [#allocation3], 0  ;;  %v301_v26 = vpack.c.bf16 %v30_v22, %v29_v21  ;;  %v303_v27 = vpack.c.bf16 %v48_v24, %v47_v23  ;;  %v31_v28 = vld [vmem:[%s520_s1 + $0x40] sm:$0xff]  ;;  %v32_v29 = vld [vmem:[%s520_s1 + $0x48] sm:$0xff]  ;;  %v353_v53 = vmov 0.0|0.0   ;;  %vm354_vm0 = vmmov 0  }
   0xc   :  { %v49_v30 = vld [vmem:[%s520_s1 + $0xd0] sm:$0xff]  ;;  %v50_v31 = vld [vmem:[%s520_s1 + $0xd8] sm:$0xff]  ;;  %v305_v32 = vpack.c.bf16 %v32_v29, %v31_v28  ;;  %v51_v36 = vld [vmem:[%s520_s1 + $0xe0] sm:$0xff]  ;;  %319 = vmatprep.subr.bf16.mxu1 %v353_v53  ;;  %v355_v57 = vmov 0.0   ;;  %vm144_vm1 = vcmask 261120  }
   0xd   :  { %298 = vmatpush3.bf16.msra.mxu0 %v297_v19  ;;  %v307_v33 = vpack.c.bf16 %v50_v31, %v49_v30  ;;  %v33_v34 = vld [vmem:[%s520_s1 + $0x50] sm:$0xff]  ;;  %v34_v35 = vld [vmem:[%s520_s1 + $0x58] sm:$0xff]  ;;  %v52_v37 = vld [vmem:[%s520_s1 + $0xe8] sm:$0xff]  ;;  %284 = vmatprep.mubr.msk.f32.mxu1 %vm354_vm0, %v355_v57 }
   0xe   :  { %300 = vmatprep.subr.bf16.mxu0 %v299_v20  ;;  %v309_v38 = vpack.c.bf16 %v34_v35, %v33_v34  ;;  %v311_v39 = vpack.c.bf16 %v52_v37, %v51_v36  ;;  %v35_v40 = vld [vmem:[%s520_s1 + $0x60] sm:$0xff]  ;;  %v36_v41 = vld [vmem:[%s520_s1 + $0x68] sm:$0xff]  ;;  %v53_v42 = vld [vmem:[%s520_s1 + $0xf0] sm:$0xff] }
   0xf   :  { %v54_v43 = vld [vmem:[%s520_s1 + $0xf8] sm:$0xff]  ;;  %v313_v44 = vpack.c.bf16 %v36_v41, %v35_v40  ;;  %v37_v46 = vld [vmem:[%s520_s1 + $0x70] sm:$0xff]  ;;  %v21_v49 = vld [vmem:[%s519_s0] sm:$0xff] }
  0x10   :  { %v315_v45 = vpack.c.bf16 %v54_v43, %v53_v42  ;;  %v38_v47 = vld [vmem:[%s520_s1 + $0x78] sm:$0xff]  ;;  %v133_v50 = vld [vmem:[%s522_s3] sm:$0xff]  ;;  %v134_v51 = vld [vmem:[%s522_s3 + $0x8] sm:$0xff] }
  0x11   :  { %302 = vmatpush3.bf16.msra.mxu0 %v301_v26  ;;  %v317_v48 = vpack.c.bf16 %v38_v47, %v37_v46  ;;  %v320_v52 = vpack.c.bf16 %v134_v51, %v133_v50  ;;  %v135_v54 = vld [vmem:[%s522_s3 + $0x10] sm:$0xff]  ;;  %v136_v55 = vld [vmem:[%s522_s3 + $0x18] sm:$0xff]  ;;  %v233_v59 = vld [vmem:[%s521_s2] ss:$0 sm:$0xff]  ;;  %s356_s3 = smov [#allocation2]  }
  0x12   :  { %304 = vmatprep.subr.bf16.mxu0 %v303_v27  ;;  %v323_v56 = vpack.c.bf16 %v136_v55, %v135_v54  ;;  %v234_v0 = vld [vmem:[%s523_s4] ss:$0 sm:$0xff]  ;;  %s225_s21 = sshll.u32 %s356_s3, 4  ;;  %s226_s21 = int_to_ptr.vmem [resolvable:$true] %s225_s21 }
  0x13   :  { %321 = vmatpush3.bf16.msra.mxu1 %v320_v52  ;;  %s329_s22 = scalar_lea.vmem %s226_s21, 128  ;;  %p334_p1 = scmp.lt.s32.totalorder %s226_s21, %s226_s21 }
  0x14   :  { %322 = vmatprep.subr.bf16.mxu1 %v353_v53  ;;  %p330_p0 = scmp.ne.s32.totalorder %s226_s21, %s329_s22  ;;  %p335_p2 = scmp.lt.s32.totalorder %s329_s22, %s329_s22 }
  0x15   :  { %306 = vmatpush3.bf16.msra.mxu0 %v305_v32 }
  0x16   :  { %308 = vmatprep.subr.bf16.mxu0 %v307_v33  ;;  %p336_p3 = por %p335_p2, %p334_p1 }
  0x17   :  { %324 = vmatpush3.bf16.msra.mxu1 %v323_v56 }
  0x18   :  { %p337_p4 = pnand %p336_p3, %p330_p0 }
  0x19   :  { %310 = vmatpush3.bf16.msra.mxu0 %v309_v38 }
  0x1a   :  { %312 = vmatprep.subr.bf16.mxu0 %v311_v39 }
  0x1d   :  { %314 = vmatpush3.bf16.msra.mxu0 %v313_v44 }
  0x1e   :  { %316 = vmatprep.subr.bf16.mxu0 %v315_v45 }
  0x21   :  { %318 = vmatpush3.bf16.msra.mxu0 %v317_v48 }
  0x24   :  { %127 = vmatmul.mubr.f32.vlgmr.msra.gmra.mrb[0].mxu0 %v21_v49 }
  0xf7   :  { %v268_v58 = vpop.f32.mrb[0].mxu0 }
  0xf8   :  { %v269_v60 = vpop.f32.mrb[1].mxu0 }
  0xf9   :  { %v270_v61 = vadd.f32 %v269_v60, %v268_v58 }
  0xfb   :  { %v129_v62 = vadd.f32 %v270_v61, %v233_v59 }
  0xfd   :  { %v132_v63 = vmax.f32 %v129_v62, 0.0 }
  0xff   :  { %285 = vmatmul.mubr.msk.f32.vlgmr.msra.gmra.mrb[0].mxu1 %vm144_vm1, %v132_v63 }
 0x1d2   :  { %v214_v1 = vpop.f32.mrb[0].mxu1 }
 0x1d3   :  { %v215_v2 = vadd.f32 %v234_v0, %v214_v1  ;;  %v286_v3 = vpop.f32.mrb[1].mxu1 }
 0x1d5   :  { %218 = vst.msk [vmem:[#allocation2] sm:$0xff] %vm144_vm1, %v215_v2 }
 0x1d6   :  { %340 = shalt.err (!%p337_p4)
}
 0x1d7   :  { %s341_s24 = scalar_lea.hbm %s524_s5, 128 }
 0x1d8   :  { %p342_p5 = scmp.ne.s32.totalorder %s524_s5, %s341_s24  ;;  %p345_p6 = scmp.lt.u32.totalorder %s341_s24, %s524_s5 }
 0x1da   :  { %p347_p7 = pnand %p345_p6, %p342_p5 }
 0x1dc   :  { %350 = shalt.err (!%p347_p7)
}
 0x1dd   :  { %228 = dma.vmem_to_hbm [thread:$0]  %s226_s21, 128, %s524_s5, [#allocation3]  }
 0x1de   :  { %351 = dma.done.wait [#allocation3], 128  }
 0x1df   :  { %352 = vsyncadd [#allocation3], 4294967168 }
 0x1e0   :  { %232 = vsyncpa [#allocation3], 1 }

</bundles_post_ra>
